<compile_context>
chip_gen: v7x
topology: tpu7x:2x2x1
jax: 0.10.0
libtpu: 0.0.40
codegen_flags: <defaults>
</compile_context>

<pallas_src>
import jax
import jax.numpy as jnp
from jax.experimental import pallas as pl
from jax.experimental.pallas import tpu as pltpu

INPUT_SIZE = 13
OUTPUT_SIZE = 1

LANE = 128
DEFAULT_BLOCK_LANES = 16384  # 13 * 16K * 4 B ~= 832 KiB x-block; trivially fits VMEM.


def _round_up(n, m):
    return ((n + m - 1) // m) * m


def _linear_kernel(x_ref, w_ref, b_ref, o_ref):
    # x_ref: (13, TN) VMEM, feature-major, batch on the lane axis.
    # w_ref: (13,) f32 SMEM scalars.  b_ref: (1,) f32 SMEM scalar.
    # o_ref: (1, TN) VMEM, lane-dense output.
    acc = jnp.full(o_ref.shape, b_ref[0], dtype=jnp.float32)
    for k in range(INPUT_SIZE):  # static unroll: 13 VPU multiply-adds, no XLU
        acc = acc + w_ref[k] * x_ref[k : k + 1, :].astype(jnp.float32)
    o_ref[...] = acc.astype(o_ref.dtype)


def housing_model_forward(x, weight, bias, *, block_lanes=DEFAULT_BLOCK_LANES):
    """x: (batch, 13) f32; weight: (1, 13) f32 (PyTorch layout); bias: (1,) f32.

    Returns (batch, 1) f32, matching torch.nn.Linear(13, 1)(x).
    """
    batch, in_features = x.shape
    assert in_features == INPUT_SIZE
    out_features, w_in = weight.shape
    assert out_features == OUTPUT_SIZE, "kernel specialized to out_features == 1"
    assert w_in == INPUT_SIZE

    # Feature-major, lane-dense layout: (13, batch), batch on lanes.
    x_t = x.astype(jnp.float32).T  # (13, batch)

    # Pad only to lane granularity (128), not to a multiple of the tile.
    b_pad = _round_up(batch, LANE)
    if b_pad != batch:
        x_t = jnp.pad(x_t, ((0, 0), (0, b_pad - batch)))

    # Lane tile: large to amortize per-grid-step overhead, but guarantee >=2
    # grid steps when the batch allows, so v7x's 2 TensorCores both get work.
    tn = min(
        _round_up(block_lanes, LANE),
        max(LANE, _round_up(pl.cdiv(b_pad, 2), LANE)),
    )
    grid = (pl.cdiv(b_pad, tn),)

    w_s = weight.reshape(-1).astype(jnp.float32)  # (13,) -> SMEM
    b_s = bias.reshape(-1).astype(jnp.float32)    # (1,)  -> SMEM

    out_p = pl.pallas_call(
        _linear_kernel,
        out_shape=jax.ShapeDtypeStruct((1, b_pad), jnp.float32),
        grid_spec=pl.GridSpec(
            grid=grid,
            in_specs=[
                pl.BlockSpec((INPUT_SIZE, tn), lambda i: (0, i)),        # x tile
                pl.BlockSpec(memory_space=pltpu.MemorySpace.SMEM),       # weights
                pl.BlockSpec(memory_space=pltpu.MemorySpace.SMEM),       # bias
            ],
            out_specs=pl.BlockSpec((1, tn), lambda i: (0, i)),           # lane-dense out
        ),
        compiler_params=pltpu.CompilerParams(
            dimension_semantics=("parallel",),  # batch-lane axis -> 2 TCs on v7x
        ),
    )(x_t, w_s, b_s)

    return out_p[0, :batch].reshape(batch, OUTPUT_SIZE)


if __name__ == "__main__":
    key = jax.random.PRNGKey(0)
    kx, kw, kb, kx2 = jax.random.split(key, 4)

    # Deterministic parameter init mimicking torch.nn.Linear's uniform init
    # (U(-1/sqrt(fan_in), 1/sqrt(fan_in))); shapes: weight (1, 13), bias (1,).
    bound = 1.0 / (INPUT_SIZE ** 0.5)
    weight = jax.random.uniform(
        kw, (OUTPUT_SIZE, INPUT_SIZE), minval=-bound, maxval=bound, dtype=jnp.float32
    )
    bias = jax.random.uniform(
        kb, (OUTPUT_SIZE,), minval=-bound, maxval=bound, dtype=jnp.float32
    )

    # Case 1: tiny, non-multiple-of-128 batch (exercises lane padding).
    batch1 = 10
    x1 = jax.random.normal(kx, (batch1, INPUT_SIZE), dtype=jnp.float32)
    out1 = jax.block_until_ready(housing_model_forward(x1, weight, bias))
    ref1 = x1 @ weight.T + bias
    assert out1.shape == (batch1, OUTPUT_SIZE)
    assert jnp.allclose(out1, ref1, atol=1e-5, rtol=1e-5)

    # Case 2: batch that forces a multi-step grid with a partial last block
    # (b_pad=384, tn=256 -> grid=2).
    batch2 = 300
    x2 = jax.random.normal(kx2, (batch2, INPUT_SIZE), dtype=jnp.float32)
    out2 = jax.block_until_ready(housing_model_forward(x2, weight, bias))
    ref2 = x2 @ weight.T + bias
    assert out2.shape == (batch2, OUTPUT_SIZE)
    assert jnp.allclose(out2, ref2, atol=1e-5, rtol=1e-5)

    print("KERNEL_OK")
</pallas_src>

<mosaic_0001>
module attributes {stable_mosaic.version = 11 : i64} {
  func.func @_linear_kernel(%arg0: i32, %arg1: memref<13x128xf32, #tpu.memory_space<vmem>>, %arg2: memref<13xf32, #tpu.memory_space<smem>>, %arg3: memref<1xf32, #tpu.memory_space<smem>>, %arg4: memref<1x128xf32, #tpu.memory_space<vmem>>) attributes {dimension_semantics = [#tpu.dimension_semantics<parallel>], iteration_bounds = array<i64: 1>, scalar_prefetch = 0 : i64, scratch_operands = 0 : i64, tpu.core_type = #tpu.core_type<tc>, window_params = [{transform_indices = @transform_0, window_bounds = array<i64: 13, 128>}, {transform_indices = @transform_1, window_bounds = array<i64: 13>}, {transform_indices = @transform_2, window_bounds = array<i64: 1>}, {transform_indices = @transform_3, window_bounds = array<i64: 1, 128>}]} {
    %c0 = arith.constant 0 : index
    %0 = memref.load %arg3[%c0] : memref<1xf32, #tpu.memory_space<smem>>
    %1 = vector.broadcast %0 : f32 to vector<1x128xf32>
    %c0_0 = arith.constant 0 : index
    %2 = memref.load %arg2[%c0_0] : memref<13xf32, #tpu.memory_space<smem>>
    %c0_1 = arith.constant 0 : index
    %c0_2 = arith.constant 0 : index
    %3 = vector.load %arg1[%c0_1, %c0_2] : memref<13x128xf32, #tpu.memory_space<vmem>>, vector<1x128xf32>
    %4 = vector.broadcast %2 : f32 to vector<1x128xf32>
    %5 = arith.mulf %4, %3 : vector<1x128xf32>
    %6 = arith.addf %1, %5 : vector<1x128xf32>
    %c1 = arith.constant 1 : index
    %7 = memref.load %arg2[%c1] : memref<13xf32, #tpu.memory_space<smem>>
    %c1_3 = arith.constant 1 : index
    %c0_4 = arith.constant 0 : index
    %8 = vector.load %arg1[%c1_3, %c0_4] : memref<13x128xf32, #tpu.memory_space<vmem>>, vector<1x128xf32>
    %9 = vector.broadcast %7 : f32 to vector<1x128xf32>
    %10 = arith.mulf %9, %8 : vector<1x128xf32>
    %11 = arith.addf %6, %10 : vector<1x128xf32>
    %c2 = arith.constant 2 : index
    %12 = memref.load %arg2[%c2] : memref<13xf32, #tpu.memory_space<smem>>
    %c2_5 = arith.constant 2 : index
    %c0_6 = arith.constant 0 : index
    %13 = vector.load %arg1[%c2_5, %c0_6] : memref<13x128xf32, #tpu.memory_space<vmem>>, vector<1x128xf32>
    %14 = vector.broadcast %12 : f32 to vector<1x128xf32>
    %15 = arith.mulf %14, %13 : vector<1x128xf32>
    %16 = arith.addf %11, %15 : vector<1x128xf32>
    %c3 = arith.constant 3 : index
    %17 = memref.load %arg2[%c3] : memref<13xf32, #tpu.memory_space<smem>>
    %c3_7 = arith.constant 3 : index
    %c0_8 = arith.constant 0 : index
    %18 = vector.load %arg1[%c3_7, %c0_8] : memref<13x128xf32, #tpu.memory_space<vmem>>, vector<1x128xf32>
    %19 = vector.broadcast %17 : f32 to vector<1x128xf32>
    %20 = arith.mulf %19, %18 : vector<1x128xf32>
    %21 = arith.addf %16, %20 : vector<1x128xf32>
    %c4 = arith.constant 4 : index
    %22 = memref.load %arg2[%c4] : memref<13xf32, #tpu.memory_space<smem>>
    %c4_9 = arith.constant 4 : index
    %c0_10 = arith.constant 0 : index
    %23 = vector.load %arg1[%c4_9, %c0_10] : memref<13x128xf32, #tpu.memory_space<vmem>>, vector<1x128xf32>
    %24 = vector.broadcast %22 : f32 to vector<1x128xf32>
    %25 = arith.mulf %24, %23 : vector<1x128xf32>
    %26 = arith.addf %21, %25 : vector<1x128xf32>
    %c5 = arith.constant 5 : index
    %27 = memref.load %arg2[%c5] : memref<13xf32, #tpu.memory_space<smem>>
    %c5_11 = arith.constant 5 : index
    %c0_12 = arith.constant 0 : index
    %28 = vector.load %arg1[%c5_11, %c0_12] : memref<13x128xf32, #tpu.memory_space<vmem>>, vector<1x128xf32>
    %29 = vector.broadcast %27 : f32 to vector<1x128xf32>
    %30 = arith.mulf %29, %28 : vector<1x128xf32>
    %31 = arith.addf %26, %30 : vector<1x128xf32>
    %c6 = arith.constant 6 : index
    %32 = memref.load %arg2[%c6] : memref<13xf32, #tpu.memory_space<smem>>
    %c6_13 = arith.constant 6 : index
    %c0_14 = arith.constant 0 : index
    %33 = vector.load %arg1[%c6_13, %c0_14] : memref<13x128xf32, #tpu.memory_space<vmem>>, vector<1x128xf32>
    %34 = vector.broadcast %32 : f32 to vector<1x128xf32>
    %35 = arith.mulf %34, %33 : vector<1x128xf32>
    %36 = arith.addf %31, %35 : vector<1x128xf32>
    %c7 = arith.constant 7 : index
    %37 = memref.load %arg2[%c7] : memref<13xf32, #tpu.memory_space<smem>>
    %c7_15 = arith.constant 7 : index
    %c0_16 = arith.constant 0 : index
    %38 = vector.load %arg1[%c7_15, %c0_16] : memref<13x128xf32, #tpu.memory_space<vmem>>, vector<1x128xf32>
    %39 = vector.broadcast %37 : f32 to vector<1x128xf32>
    %40 = arith.mulf %39, %38 : vector<1x128xf32>
    %41 = arith.addf %36, %40 : vector<1x128xf32>
    %c8 = arith.constant 8 : index
    %42 = memref.load %arg2[%c8] : memref<13xf32, #tpu.memory_space<smem>>
    %c8_17 = arith.constant 8 : index
    %c0_18 = arith.constant 0 : index
    %43 = vector.load %arg1[%c8_17, %c0_18] : memref<13x128xf32, #tpu.memory_space<vmem>>, vector<1x128xf32>
    %44 = vector.broadcast %42 : f32 to vector<1x128xf32>
    %45 = arith.mulf %44, %43 : vector<1x128xf32>
    %46 = arith.addf %41, %45 : vector<1x128xf32>
    %c9 = arith.constant 9 : index
    %47 = memref.load %arg2[%c9] : memref<13xf32, #tpu.memory_space<smem>>
    %c9_19 = arith.constant 9 : index
    %c0_20 = arith.constant 0 : index
    %48 = vector.load %arg1[%c9_19, %c0_20] : memref<13x128xf32, #tpu.memory_space<vmem>>, vector<1x128xf32>
    %49 = vector.broadcast %47 : f32 to vector<1x128xf32>
    %50 = arith.mulf %49, %48 : vector<1x128xf32>
    %51 = arith.addf %46, %50 : vector<1x128xf32>
    %c10 = arith.constant 10 : index
    %52 = memref.load %arg2[%c10] : memref<13xf32, #tpu.memory_space<smem>>
    %c10_21 = arith.constant 10 : index
    %c0_22 = arith.constant 0 : index
    %53 = vector.load %arg1[%c10_21, %c0_22] : memref<13x128xf32, #tpu.memory_space<vmem>>, vector<1x128xf32>
    %54 = vector.broadcast %52 : f32 to vector<1x128xf32>
    %55 = arith.mulf %54, %53 : vector<1x128xf32>
    %56 = arith.addf %51, %55 : vector<1x128xf32>
    %c11 = arith.constant 11 : index
    %57 = memref.load %arg2[%c11] : memref<13xf32, #tpu.memory_space<smem>>
    %c11_23 = arith.constant 11 : index
    %c0_24 = arith.constant 0 : index
    %58 = vector.load %arg1[%c11_23, %c0_24] : memref<13x128xf32, #tpu.memory_space<vmem>>, vector<1x128xf32>
    %59 = vector.broadcast %57 : f32 to vector<1x128xf32>
    %60 = arith.mulf %59, %58 : vector<1x128xf32>
    %61 = arith.addf %56, %60 : vector<1x128xf32>
    %c12 = arith.constant 12 : index
    %62 = memref.load %arg2[%c12] : memref<13xf32, #tpu.memory_space<smem>>
    %c12_25 = arith.constant 12 : index
    %c0_26 = arith.constant 0 : index
    %63 = vector.load %arg1[%c12_25, %c0_26] : memref<13x128xf32, #tpu.memory_space<vmem>>, vector<1x128xf32>
    %64 = vector.broadcast %62 : f32 to vector<1x128xf32>
    %65 = arith.mulf %64, %63 : vector<1x128xf32>
    %66 = arith.addf %61, %65 : vector<1x128xf32>
    %c0_27 = arith.constant 0 : index
    %c0_28 = arith.constant 0 : index
    %67 = vector.load %arg4[%c0_27, %c0_28] : memref<1x128xf32, #tpu.memory_space<vmem>>, vector<1x128xf32>
    tpu.vector_store %arg4[%c0_27, %c0_28], %66 {strides = array<i32>} : memref<1x128xf32, #tpu.memory_space<vmem>>, vector<1x128xf32>,
    return
  }
  func.func @transform_0(%arg0: i32) -> (i32, i32) {
    %c0_i32 = arith.constant 0 : i32
    %c0_i32_0 = arith.constant 0 : i32
    return %c0_i32, %arg0 : i32, i32
  }
  func.func @transform_1(%arg0: i32) -> i32 {
    %c0_i32 = arith.constant 0 : i32
    %c0_i32_0 = arith.constant 0 : i32
    return %c0_i32 : i32
  }
  func.func @transform_2(%arg0: i32) -> i32 {
    %c0_i32 = arith.constant 0 : i32
    %c0_i32_0 = arith.constant 0 : i32
    return %c0_i32 : i32
  }
  func.func @transform_3(%arg0: i32) -> (i32, i32) {
    %c0_i32 = arith.constant 0 : i32
    %c0_i32_0 = arith.constant 0 : i32
    return %c0_i32, %arg0 : i32, i32
  }
}

</mosaic_0001>

<bundles_post_ra>
// kernel: tpu_custom_call.1
= control target key start
LH: loop header
LB: loop body
LE: loop exit
PB: predicated region body
PF: predicated region fallthrough
CT: control target
= control target key end

     0   :  { %9 = vsyncpa [#allocation4], 0  ;;  %s261_s0 = inlined_call_operand.hbm [shape: f32[13,128], index: 0, kind: input, shape index: {}]   ;;  %s262_s1 = inlined_call_operand.vmem [shape: f32[13], index: 1, kind: input, shape index: {}]   ;;  %s263_s2 = inlined_call_operand.<no memory space> [shape: f32[1], index: 2, kind: input, shape index: {}]   ;;  %s264_s3 = inlined_call_operand.hbm [shape: f32[1,128], index: 3, kind: output, shape index: {}]  }
   0x1   :  { %10 = vsyncpa [#allocation6], 0 }
   0x2   :  { %11 = vsyncpa [#allocation5], 0  ;;  %s206_s12 = smov [#allocation3]   ;;  %s30_s16 = sshll.u32 %s262_s1, 4  ;;  %s31_s16 = int_to_ptr.vmem [resolvable:$true] %s30_s16 }
   0x3   :  { %s17_s13 = sshll.u32 %s206_s12, 4  ;;  %s144_s19 = scalar_lea.hbm %s261_s0, 256  ;;  %s18_s13 = int_to_ptr.vmem [resolvable:$true] %s17_s13 }
   0x4   :  { %p145_p0 = scmp.ne.s32.totalorder %s261_s0, %s144_s19  ;;  %p148_p1 = scmp.lt.u32.totalorder %s144_s19, %s261_s0 }
   0x6   :  { %p150_p2 = pnand %p148_p1, %p145_p0 }
   0x8   :  { %153 = shalt.err (!%p150_p2)
}
   0x9   :  { %s154_s24 = scalar_lea.vmem %s18_s13, 256  ;;  %p159_p4 = scmp.lt.s32.totalorder %s18_s13, %s18_s13 }
   0xa   :  { %p155_p3 = scmp.ne.s32.totalorder %s18_s13, %s154_s24  ;;  %p160_p5 = scmp.lt.s32.totalorder %s154_s24, %s154_s24 }
   0xc   :  { %p161_p6 = por %p160_p5, %p159_p4 }
   0xe   :  { %p162_p7 = pnand %p161_p6, %p155_p3 }
  0x10   :  { %165 = shalt.err (!%p162_p7)
}
  0x11   :  { %s207_s1 = smov 128   ;;  %s208_s25 = smov 8  }
  0x12   :  { %23 = dma.hbm_to_vmem [thread:$0]  %s261_s0, 256, %s18_s13, [#allocation4], %s207_s1, %s207_s1, %s208_s25  }
  0x13   :  { %s166_s28 = scalar_lea.vmem %s31_s16, 16  ;;  %p171_p9 = scmp.lt.s32.totalorder %s31_s16, %s31_s16 }
  0x14   :  { %p167_p8 = scmp.ne.s32.totalorder %s31_s16, %s166_s28  ;;  %p172_p10 = scmp.lt.s32.totalorder %s166_s28, %s166_s28 }
  0x16   :  { %p173_p11 = por %p172_p10, %p171_p9 }
  0x18   :  { %p174_p12 = pnand %p173_p11, %p167_p8 }
  0x1a   :  { %177 = shalt.err (!%p174_p12)
}
  0x1b   :  { %s209_s29 = smov [#allocation7]  }
  0x1c   :  { %33 = dma.vmem_to_smem %s31_s16, 16, %s209_s29, [#allocation6]  }
  0x1d   :  { %200 = dma.done.wait [#allocation4], 256  }
  0x1e   :  { %201 = vsyncadd [#allocation4], 4294967040 }
  0x1f   :  { %202 = dma.done.wait [#allocation6], 16  }
  0x20   :  { %203 = vsyncadd [#allocation6], 4294967280 }
  0x21   :  { %42 = sfence }
  0x22   :  { %s45_s30 = sld [smem:[#allocation7]]  ;;  %s127_s4 = sld [smem:[#allocation7 + $0x1]]  ;;  %v46_v0 = vld [vmem:[#allocation3] sm:$0x1]  ;;  %v51_v1 = vld [vmem:[#allocation3 + $0x1] sm:$0x1]  ;;  %v44_v2 = vstv %s263_s2 }
  0x23   :  { %s128_s5 = sld [smem:[#allocation7 + $0x2]]  ;;  %s129_s6 = sld [smem:[#allocation7 + $0x3]]  ;;  %v56_v5 = vld [vmem:[#allocation3 + $0x2] sm:$0x1]  ;;  %v61_v9 = vld [vmem:[#allocation3 + $0x3] sm:$0x1] }
  0x24   :  { %s130_s0 = sld [smem:[#allocation7 + $0x4]]  ;;  %s131_s7 = sld [smem:[#allocation7 + $0x5]]  ;;  %v66_v13 = vld [vmem:[#allocation3 + $0x4] sm:$0x1]  ;;  %v71_v17 = vld [vmem:[#allocation3 + $0x5] sm:$0x1] }
  0x25   :  { %s132_s10 = sld [smem:[#allocation7 + $0x6]]  ;;  %s133_s11 = sld [smem:[#allocation7 + $0x7]]  ;;  %v76_v21 = vld [vmem:[#allocation3 + $0x6] sm:$0x1]  ;;  %v81_v25 = vld [vmem:[#allocation3 + $0x7] sm:$0x1] }
  0x26   :  { %s134_s12 = sld [smem:[#allocation7 + $0x8]]  ;;  %s135_s2 = sld [smem:[#allocation7 + $0x9]]  ;;  %v86_v29 = vld [vmem:[#allocation3 + $0x8] sm:$0x1]  ;;  %v91_v33 = vld [vmem:[#allocation3 + $0x9] sm:$0x1] }
  0x27   :  { %s136_s13 = sld [smem:[#allocation7 + $0xa]]  ;;  %s137_s14 = sld [smem:[#allocation7 + $0xb]]  ;;  %v96_v37 = vld [vmem:[#allocation3 + $0xa] sm:$0x1]  ;;  %v101_v41 = vld [vmem:[#allocation3 + $0xb] sm:$0x1] }
  0x28   :  { %v47_v3 = vstv %s45_s30  ;;  %v52_v4 = vstv %s127_s4  ;;  %s138_s15 = sld [smem:[#allocation7 + $0xc]]  ;;  %v106_v45 = vld [vmem:[#allocation3 + $0xc] sm:$0x1]  ;;  %s210_s16 = smov [#allocation8]  }
  0x29   :  { %v48_v6 = vmul.f32 %v47_v3, %v46_v0  ;;  %v53_v7 = vmul.f32 %v52_v4, %v51_v1  ;;  %v57_v8 = vstv %s128_s5  ;;  %v62_v10 = vstv %s129_s6  ;;  %s117_s17 = sshll.u32 %s210_s16, 4  ;;  %s118_s17 = int_to_ptr.vmem [resolvable:$true] %s117_s17 }
  0x2a   :  { %v58_v12 = vmul.f32 %v57_v8, %v56_v5  ;;  %v67_v14 = vstv %s130_s0  ;;  %v63_v16 = vmul.f32 %v62_v10, %v61_v9  ;;  %v72_v18 = vstv %s131_s7  ;;  %s178_s18 = scalar_lea.vmem %s118_s17, 16  ;;  %s182_s19 = scalar_lea.vmem %s118_s17, 32 }
  0x2b   :  { %v49_v11 = vadd.f32 %v48_v6, %v44_v2  ;;  %v68_v20 = vmul.f32 %v67_v14, %v66_v13  ;;  %v77_v22 = vstv %s132_s10  ;;  %v73_v24 = vmul.f32 %v72_v18, %v71_v17  ;;  %p179_p13 = scmp.ne.s32.totalorder %s118_s17, %s178_s18  ;;  %p183_p0 = scmp.lt.s32.totalorder %s118_s17, %s118_s17 }
  0x2c   :  { %v82_v26 = vstv %s133_s11  ;;  %v78_v28 = vmul.f32 %v77_v22, %v76_v21  ;;  %v87_v30 = vstv %s134_s12  ;;  %v92_v34 = vstv %s135_s2  ;;  %p184_p1 = scmp.lt.s32.totalorder %s182_s19, %s178_s18 }
  0x2d   :  { %v54_v15 = vadd.f32 %v53_v7, %v49_v11  ;;  %v83_v32 = vmul.f32 %v82_v26, %v81_v25  ;;  %v88_v36 = vmul.f32 %v87_v30, %v86_v29  ;;  %v97_v38 = vstv %s136_s13 }
  0x2e   :  { %v93_v40 = vmul.f32 %v92_v34, %v91_v33  ;;  %v102_v42 = vstv %s137_s14  ;;  %v98_v44 = vmul.f32 %v97_v38, %v96_v37  ;;  %v107_v46 = vstv %s138_s15  ;;  %p185_p2 = por %p184_p1, %p183_p0 }
  0x2f   :  { %v59_v19 = vadd.f32 %v58_v12, %v54_v15  ;;  %v103_v48 = vmul.f32 %v102_v42, %v101_v41  ;;  %v108_v50 = vmul.f32 %v107_v46, %v106_v45 }
  0x30   :  { %p186_p3 = pnand %p185_p2, %p179_p13 }
  0x31   :  { %v64_v23 = vadd.f32 %v63_v16, %v59_v19 }
  0x33   :  { %v69_v27 = vadd.f32 %v68_v20, %v64_v23 }
  0x35   :  { %v74_v31 = vadd.f32 %v73_v24, %v69_v27 }
  0x37   :  { %v79_v35 = vadd.f32 %v78_v28, %v74_v31 }
  0x39   :  { %v84_v39 = vadd.f32 %v83_v32, %v79_v35 }
  0x3b   :  { %v89_v43 = vadd.f32 %v88_v36, %v84_v39 }
  0x3d   :  { %v94_v47 = vadd.f32 %v93_v40, %v89_v43 }
  0x3f   :  { %v99_v49 = vadd.f32 %v98_v44, %v94_v47 }
  0x41   :  { %v104_v51 = vadd.f32 %v103_v48, %v99_v49 }
  0x43   :  { %v109_v52 = vadd.f32 %v108_v50, %v104_v51 }
  0x45   :  { %110 = vst [vmem:[#allocation8] sm:$0x1] %v109_v52 }
  0x46   :  { %189 = shalt.err (!%p186_p3)
}
  0x47   :  { %s190_s22 = scalar_lea.hbm %s264_s3, 16 }
  0x48   :  { %p191_p4 = scmp.ne.s32.totalorder %s264_s3, %s190_s22  ;;  %p194_p5 = scmp.lt.u32.totalorder %s190_s22, %s264_s3 }
  0x4a   :  { %p196_p6 = pnand %p194_p5, %p191_p4 }
  0x4c   :  { %199 = shalt.err (!%p196_p6)
}
  0x4d   :  { %120 = dma.vmem_to_hbm [thread:$0]  %s118_s17, 16, %s264_s3, [#allocation5]  }
  0x4e   :  { %204 = dma.done.wait [#allocation5], 16  }
  0x4f   :  { %205 = vsyncadd [#allocation5], 4294967280 }
  0x50   :  { %124 = vsyncpa [#allocation4], 1 }
  0x51   :  { %125 = vsyncpa [#allocation5], 1 }
  0x52   :  { %126 = vsyncpa [#allocation6], 1 }

</bundles_post_ra>
